<compile_context>
chip_gen: v7x
topology: tpu7x:2x2x1
jax: 0.10.0
libtpu: 0.0.40
codegen_flags: <defaults>
</compile_context>

<pallas_src>
import jax
import jax.numpy as jnp
from jax.experimental import pallas as pl
from jax.experimental.pallas import tpu as pltpu


def _round_up(x, m):
    return (x + m - 1) // m * m


def _divisors_desc(total, granule=128):
    """Multiples of `granule` that divide `total`, largest first."""
    n = total // granule
    return [granule * d for d in range(n, 0, -1) if n % d == 0]


def _vmem_capacity_bytes():
    """Physical VMEM per TensorCore (64 MiB on v7x, 128 MiB on v5e/v6e)."""
    try:
        return int(pltpu.get_tpu_info().vmem_capacity_bytes)
    except Exception:
        pass
    try:
        kind = jax.devices()[0].device_kind.lower()
    except Exception:
        kind = ""
    if "v7" in kind:
        return 64 * 1024 * 1024
    return 128 * 1024 * 1024


def _fit_bytes(tm, th, tn, in_pad, hid_pad, out_pad, ws, out_ws, ktiled, ntiled):
    """Estimated peak VMEM: double-buffered input/output slabs + scratch."""
    b = 2 * (in_pad * th + th * tn) * ws          # W1 / W2 slabs (double-buffered)
    b += 2 * tm * in_pad * ws                     # x tile (double-buffered)
    b += 2 * tm * tn * out_ws                     # out tile (double-buffered)
    b += 2 * (th + tn) * 4                        # f32 biases (double-buffered)
    if ktiled or ntiled:
        b += tm * tn * 4                          # f32 accumulator scratch
    if ntiled:
        b += tm * hid_pad * ws                    # cached hidden activations
    return b


def _plan_hn(tm, in_pad, hid_pad, out_pad, ws, out_ws, budget):
    """Pick (tile_h, tile_n): keep the weights fully resident if they fit the
    budget, else tile the hidden (reduction) dim, else also tile the output dim.
    128-granule tiles; the 'largest divisor' choice yields 256-multiples
    (preferred by the v6e/v7x 256x256 MXU) whenever the dims are 256-aligned."""
    if _fit_bytes(tm, hid_pad, out_pad, in_pad, hid_pad, out_pad, ws, out_ws,
                  False, False) <= budget:
        return hid_pad, out_pad
    for th in _divisors_desc(hid_pad):
        if _fit_bytes(tm, th, out_pad, in_pad, hid_pad, out_pad, ws, out_ws,
                      True, False) <= budget:
            return th, out_pad
    for tn in _divisors_desc(out_pad):
        for th in _divisors_desc(hid_pad):
            if _fit_bytes(tm, th, tn, in_pad, hid_pad, out_pad, ws, out_ws,
                          True, True) <= budget:
                return th, tn
    return 128, 128


# --------------------------------------------------------------------------- #
# Kernels
# --------------------------------------------------------------------------- #

def _mlp_kernel_resident(x_ref, w1_ref, b1_ref, w2_ref, b2_ref, o_ref):
    """Weights fully resident: no accumulator, single pass per batch tile."""
    h = jnp.dot(x_ref[...], w1_ref[...], preferred_element_type=jnp.float32)
    h = jnp.maximum(h + b1_ref[...], 0.0)
    y = jnp.dot(h.astype(w2_ref.dtype), w2_ref[...],
                preferred_element_type=jnp.float32)
    o_ref[...] = (y + b2_ref[...]).astype(o_ref.dtype)


def _mlp_kernel_ktiled(x_ref, w1_ref, b1_ref, w2_ref, b2_ref, o_ref, acc_ref):
    """Hidden (reduction) dim tiled: f32 accumulator with pl.when init/finalize."""
    k = pl.program_id(1)

    @pl.when(k == 0)
    def _():
        acc_ref[...] = jnp.zeros_like(acc_ref)

    h = jnp.dot(x_ref[...], w1_ref[...], preferred_element_type=jnp.float32)
    h = jnp.maximum(h + b1_ref[...], 0.0)
    acc_ref[...] += jnp.dot(h.astype(w2_ref.dtype), w2_ref[...],
                            preferred_element_type=jnp.float32)

    @pl.when(k == pl.num_programs(1) - 1)
    def _():
        o_ref[...] = (acc_ref[...] + b2_ref[...]).astype(o_ref.dtype)


def _mlp_kernel_nktiled(x_ref, w1_ref, b1_ref, w2_ref, b2_ref, o_ref,
                        h_ref, acc_ref):
    """Hidden + output dims tiled: the hidden activations of the current batch
    tile are cached in VMEM (written at n == 0) so the first matmul runs only
    once per (batch tile, hidden tile)."""
    n = pl.program_id(1)
    k = pl.program_id(2)

    @pl.when(k == 0)
    def _():
        acc_ref[...] = jnp.zeros_like(acc_ref)

    @pl.when(n == 0)
    def _():
        h = jnp.dot(x_ref[...], w1_ref[...], preferred_element_type=jnp.float32)
        h = jnp.maximum(h + b1_ref[...], 0.0)
        h_ref[k] = h.astype(h_ref.dtype)

    acc_ref[...] += jnp.dot(h_ref[k], w2_ref[...],
                            preferred_element_type=jnp.float32)

    @pl.when(k == pl.num_programs(2) - 1)
    def _():
        o_ref[...] = (acc_ref[...] + b2_ref[...]).astype(o_ref.dtype)


# --------------------------------------------------------------------------- #
# Wrapper
# --------------------------------------------------------------------------- #

def mlp_forward(x, w1, b1, w2, b2, *, tile_m=None, tile_h=None, tile_n=None,
                use_bf16=True, out_dtype=None, vmem_limit_bytes=None):
    """y = relu(x @ w1 + b1) @ w2 + b2.

    x: (B, in); w1: (in, hidden); b1: (hidden,); w2: (hidden, out); b2: (out,).
    Returns (B, out) in `out_dtype` (defaults to x.dtype; bf16 halves writeback)."""
    batch, in_dim = x.shape
    assert w1.shape[0] == in_dim
    hidden = w1.shape[1]
    assert w2.shape[0] == hidden and b1.shape == (hidden,)
    out_dim = w2.shape[1]
    assert b2.shape == (out_dim,)
    if out_dtype is None:
        out_dtype = x.dtype

    compute_dtype = jnp.bfloat16 if use_bf16 else x.dtype
    ws = jnp.dtype(compute_dtype).itemsize
    out_ws = jnp.dtype(out_dtype).itemsize

    # Generation-aware VMEM budgeting: 64 MiB parts (v7x) -> ~48 MiB scoped
    # limit, 128 MiB parts (v5e/v6e) -> ~112 MiB; plan tiles against ~85% of it.
    capacity = _vmem_capacity_bytes()
    if vmem_limit_bytes is None:
        vmem_limit_bytes = (48 << 20) if capacity <= (64 << 20) else (112 << 20)
    budget = int(vmem_limit_bytes * 0.85)

    # Lane-align every dim (zero padding is exact: zero x cols x zero W1 rows,
    # relu(0)=0 hidden cols x zero W2 rows, zero W2 cols/b2 -> zero output cols
    # which are sliced off below).
    in_pad = _round_up(in_dim, 128)
    hid_pad = _round_up(hidden, 128)
    out_pad = _round_up(out_dim, 128)
    if tile_h is not None:
        assert tile_h % 128 == 0, "tile_h must be a multiple of 128"
        hid_pad = _round_up(hid_pad, tile_h)
    if tile_n is not None:
        assert tile_n % 128 == 0, "tile_n must be a multiple of 128"
        out_pad = _round_up(out_pad, tile_n)

    # Batch tile: >= 16 rows (bf16 sublane packing), 256-row tiles preferred.
    b16 = _round_up(batch, 16)
    tm = min(256, b16) if tile_m is None else min(_round_up(tile_m, 16), b16)

    if tile_h is None and tile_n is None:
        th, tn = _plan_hn(tm, in_pad, hid_pad, out_pad, ws, out_ws, budget)
        # When the hidden dim is tiled the full weight set is re-streamed once
        # per batch tile; amortize with bigger M tiles if VMEM allows (matters
        # most on v5e's low HBM bandwidth).
        if th < hid_pad and tile_m is None and b16 >= 512:
            for cand in (512, 384):
                if cand <= b16 and _fit_bytes(cand, th, tn, in_pad, hid_pad,
                                              out_pad, ws, out_ws, True,
                                              tn < out_pad) <= budget:
                    tm = cand
                    break
    else:
        th = tile_h if tile_h is not None else hid_pad
        tn = tile_n if tile_n is not None else out_pad

    batch_pad = _round_up(batch, tm)
    num_m = batch_pad // tm
    num_k = hid_pad // th
    num_n = out_pad // tn

    # Pad + cast in the wrapper: bf16 operands -> full-rate MXU, half the
    # weight HBM/VMEM traffic; biases stay f32 and both dots accumulate in f32.
    xc = jnp.pad(x, ((0, batch_pad - batch), (0, in_pad - in_dim))).astype(compute_dtype)
    w1c = jnp.pad(w1, ((0, in_pad - in_dim), (0, hid_pad - hidden))).astype(compute_dtype)
    w2c = jnp.pad(w2, ((0, hid_pad - hidden), (0, out_pad - out_dim))).astype(compute_dtype)
    b1c = jnp.pad(b1, (0, hid_pad - hidden)).reshape(1, hid_pad).astype(jnp.float32)
    b2c = jnp.pad(b2, (0, out_pad - out_dim)).reshape(1, out_pad).astype(jnp.float32)

    # HBM traffic estimate (weights re-streamed per batch tile when not resident;
    # W1 additionally per output tile in the n-tiled path).
    w1_passes = 1 if (num_k == 1 and num_n == 1) else num_m * num_n
    w2_passes = 1 if (num_k == 1 and num_n == 1) else num_m
    bytes_accessed = (xc.size * ws
                      + w1c.size * ws * w1_passes
                      + w2c.size * ws * w2_passes
                      + b1c.size * 4 + b2c.size * 4
                      + batch_pad * out_pad * out_ws)
    flops = 2 * batch_pad * in_pad * hid_pad + 2 * batch_pad * hid_pad * out_pad
    cost = pl.CostEstimate(flops=int(flops), transcendentals=0,
                           bytes_accessed=int(bytes_accessed))

    if num_k == 1 and num_n == 1:
        # Fully-resident fast path: no accumulator scratch, no zero-init pass.
        out_padded = pl.pallas_call(
            _mlp_kernel_resident,
            out_shape=jax.ShapeDtypeStruct((batch_pad, out_pad), out_dtype),
            grid_spec=pltpu.PrefetchScalarGridSpec(
                num_scalar_prefetch=0,
                grid=(num_m,),
                in_specs=[
                    pl.BlockSpec((tm, in_pad), lambda i: (i, 0)),
                    pl.BlockSpec((in_pad, hid_pad), lambda i: (0, 0)),
                    pl.BlockSpec((1, hid_pad), lambda i: (0, 0)),
                    pl.BlockSpec((hid_pad, out_pad), lambda i: (0, 0)),
                    pl.BlockSpec((1, out_pad), lambda i: (0, 0)),
                ],
                out_specs=pl.BlockSpec((tm, out_pad), lambda i: (i, 0)),
            ),
            compiler_params=pltpu.CompilerParams(
                dimension_semantics=("parallel",),
                vmem_limit_bytes=int(vmem_limit_bytes)),
            cost_estimate=cost,
        )(xc, w1c, b1c, w2c, b2c)
    elif num_n == 1:
        out_padded = pl.pallas_call(
            _mlp_kernel_ktiled,
            out_shape=jax.ShapeDtypeStruct((batch_pad, out_pad), out_dtype),
            grid_spec=pltpu.PrefetchScalarGridSpec(
                num_scalar_prefetch=0,
                grid=(num_m, num_k),
                in_specs=[
                    pl.BlockSpec((tm, in_pad), lambda i, k: (i, 0)),
                    pl.BlockSpec((in_pad, th), lambda i, k: (0, k)),
                    pl.BlockSpec((1, th), lambda i, k: (0, k)),
                    pl.BlockSpec((th, out_pad), lambda i, k: (k, 0)),
                    pl.BlockSpec((1, out_pad), lambda i, k: (0, 0)),
                ],
                out_specs=pl.BlockSpec((tm, out_pad), lambda i, k: (i, 0)),
                scratch_shapes=[pltpu.VMEM((tm, out_pad), jnp.float32)],
            ),
            compiler_params=pltpu.CompilerParams(
                dimension_semantics=("parallel", "arbitrary"),
                vmem_limit_bytes=int(vmem_limit_bytes)),
            cost_estimate=cost,
        )(xc, w1c, b1c, w2c, b2c)
    else:
        out_padded = pl.pallas_call(
            _mlp_kernel_nktiled,
            out_shape=jax.ShapeDtypeStruct((batch_pad, out_pad), out_dtype),
            grid_spec=pltpu.PrefetchScalarGridSpec(
                num_scalar_prefetch=0,
                grid=(num_m, num_n, num_k),
                in_specs=[
                    pl.BlockSpec((tm, in_pad), lambda i, n, k: (i, 0)),
                    pl.BlockSpec((in_pad, th), lambda i, n, k: (0, k)),
                    pl.BlockSpec((1, th), lambda i, n, k: (0, k)),
                    pl.BlockSpec((th, tn), lambda i, n, k: (k, n)),
                    pl.BlockSpec((1, tn), lambda i, n, k: (0, n)),
                ],
                out_specs=pl.BlockSpec((tm, tn), lambda i, n, k: (i, n)),
                scratch_shapes=[
                    pltpu.VMEM((num_k, tm, th), compute_dtype),   # hidden cache
                    pltpu.VMEM((tm, tn), jnp.float32),            # accumulator
                ],
            ),
            compiler_params=pltpu.CompilerParams(
                dimension_semantics=("parallel", "arbitrary", "arbitrary"),
                vmem_limit_bytes=int(vmem_limit_bytes)),
            cost_estimate=cost,
        )(xc, w1c, b1c, w2c, b2c)

    return out_padded[:batch, :out_dim]


def mlp_reference(x, w1, b1, w2, b2, *, use_bf16=True):
    """Pure-JAX reference emulating the kernel's bf16-operand / f32-accumulate math."""
    if use_bf16:
        cast = lambda a: a.astype(jnp.bfloat16).astype(jnp.float32)
    else:
        cast = lambda a: a
    h = jnp.maximum(
        jnp.dot(cast(x), cast(w1), precision=jax.lax.Precision.HIGHEST) + b1, 0.0)
    return jnp.dot(cast(h), cast(w2), precision=jax.lax.Precision.HIGHEST) + b2


if __name__ == "__main__":
    key = jax.random.PRNGKey(0)

    def make(batch, in_dim, hidden, out_dim, k):
        kx, kw1, kb1, kw2, kb2 = jax.random.split(k, 5)
        x = jax.random.normal(kx, (batch, in_dim), dtype=jnp.float32)
        w1 = jax.random.normal(kw1, (in_dim, hidden), dtype=jnp.float32) * (1.0 / in_dim ** 0.5)
        b1 = jax.random.normal(kb1, (hidden,), dtype=jnp.float32) * 0.01
        w2 = jax.random.normal(kw2, (hidden, out_dim), dtype=jnp.float32) * (1.0 / hidden ** 0.5)
        b2 = jax.random.normal(kb2, (out_dim,), dtype=jnp.float32) * 0.01
        return x, w1, b1, w2, b2

    # 1) Shapes implied by MLP(input_dim, hidden_dim, output_dim) -> resident path.
    x, w1, b1, w2, b2 = make(8, 32, 64, 16, key)
    out = jax.block_until_ready(mlp_forward(x, w1, b1, w2, b2))
    ref = mlp_reference(x, w1, b1, w2, b2)
    assert out.shape == (8, 16)
    assert jnp.allclose(out, ref.astype(out.dtype), atol=2e-2, rtol=2e-2), "resident mismatch"

    # 2) Hidden-tiled (f32 accumulator) path, still small shapes.
    x, w1, b1, w2, b2 = make(32, 128, 256, 128, jax.random.fold_in(key, 1))
    out = jax.block_until_ready(mlp_forward(x, w1, b1, w2, b2, tile_h=128))
    ref = mlp_reference(x, w1, b1, w2, b2)
    assert out.shape == (32, 128)
    assert jnp.allclose(out, ref.astype(out.dtype), atol=2e-2, rtol=2e-2), "k-tiled mismatch"

    # 3) Hidden + output tiled (VMEM hidden-activation cache) path.
    x, w1, b1, w2, b2 = make(32, 128, 256, 256, jax.random.fold_in(key, 2))
    out = jax.block_until_ready(mlp_forward(x, w1, b1, w2, b2, tile_h=128, tile_n=128))
    ref = mlp_reference(x, w1, b1, w2, b2)
    assert out.shape == (32, 256)
    assert jnp.allclose(out, ref.astype(out.dtype), atol=2e-2, rtol=2e-2), "nk-tiled mismatch"

    print("KERNEL_OK")
</pallas_src>

<mosaic_0001>
module attributes {stable_mosaic.version = 11 : i64} {
  func.func @_mlp_kernel_resident(%arg0: i32, %arg1: memref<16x128xbf16, #tpu.memory_space<vmem>>, %arg2: memref<128x128xbf16, #tpu.memory_space<vmem>>, %arg3: memref<1x128xf32, #tpu.memory_space<vmem>>, %arg4: memref<128x128xbf16, #tpu.memory_space<vmem>>, %arg5: memref<1x128xf32, #tpu.memory_space<vmem>>, %arg6: memref<16x128xf32, #tpu.memory_space<vmem>>) attributes {dimension_semantics = [#tpu.dimension_semantics<parallel>], iteration_bounds = array<i64: 1>, scalar_prefetch = 0 : i64, scratch_operands = 0 : i64, tpu.core_type = #tpu.core_type<tc>, window_params = [{transform_indices = @transform_0, window_bounds = array<i64: 16, 128>}, {pipeline_mode = #tpu.pipeline_mode<synchronous>, transform_indices = @transform_1, window_bounds = array<i64: 128, 128>}, {pipeline_mode = #tpu.pipeline_mode<synchronous>, transform_indices = @transform_2, window_bounds = array<i64: 1, 128>}, {pipeline_mode = #tpu.pipeline_mode<synchronous>, transform_indices = @transform_3, window_bounds = array<i64: 128, 128>}, {pipeline_mode = #tpu.pipeline_mode<synchronous>, transform_indices = @transform_4, window_bounds = array<i64: 1, 128>}, {transform_indices = @transform_5, window_bounds = array<i64: 16, 128>}]} {
    %c0 = arith.constant 0 : index
    %c0_0 = arith.constant 0 : index
    %0 = vector.load %arg1[%c0, %c0_0] : memref<16x128xbf16, #tpu.memory_space<vmem>>, vector<16x128xbf16>
    %c0_1 = arith.constant 0 : index
    %c0_2 = arith.constant 0 : index
    %1 = vector.load %arg2[%c0_1, %c0_2] : memref<128x128xbf16, #tpu.memory_space<vmem>>, vector<128x128xbf16>
    %cst = arith.constant dense<0.000000e+00> : vector<16x128xf32>
    %2 = tpu.matmul %0, %1, %cst {dimension_numbers = #tpu.dot_dimension_numbers<[1], [0], [0], [1], [0, 0, 1, 1], [], []>} : vector<16x128xbf16>, vector<128x128xbf16>, vector<16x128xf32> -> vector<16x128xf32>
    %c0_3 = arith.constant 0 : index
    %c0_4 = arith.constant 0 : index
    %3 = vector.load %arg3[%c0_3, %c0_4] : memref<1x128xf32, #tpu.memory_space<vmem>>, vector<1x128xf32>
    %4 = vector.broadcast %3 : vector<1x128xf32> to vector<16x128xf32>
    %5 = arith.addf %2, %4 : vector<16x128xf32>
    %cst_5 = arith.constant 0.000000e+00 : f32
    %6 = vector.broadcast %cst_5 : f32 to vector<16x128xf32>
    %7 = arith.maximumf %5, %6 : vector<16x128xf32>
    %8 = arith.truncf %7 : vector<16x128xf32> to vector<16x128xbf16>
    %c0_6 = arith.constant 0 : index
    %c0_7 = arith.constant 0 : index
    %9 = vector.load %arg4[%c0_6, %c0_7] : memref<128x128xbf16, #tpu.memory_space<vmem>>, vector<128x128xbf16>
    %cst_8 = arith.constant dense<0.000000e+00> : vector<16x128xf32>
    %10 = tpu.matmul %8, %9, %cst_8 {dimension_numbers = #tpu.dot_dimension_numbers<[1], [0], [0], [1], [0, 0, 1, 1], [], []>} : vector<16x128xbf16>, vector<128x128xbf16>, vector<16x128xf32> -> vector<16x128xf32>
    %c0_9 = arith.constant 0 : index
    %c0_10 = arith.constant 0 : index
    %11 = vector.load %arg5[%c0_9, %c0_10] : memref<1x128xf32, #tpu.memory_space<vmem>>, vector<1x128xf32>
    %12 = vector.broadcast %11 : vector<1x128xf32> to vector<16x128xf32>
    %13 = arith.addf %10, %12 : vector<16x128xf32>
    %c0_11 = arith.constant 0 : index
    %c0_12 = arith.constant 0 : index
    %14 = vector.load %arg6[%c0_11, %c0_12] : memref<16x128xf32, #tpu.memory_space<vmem>>, vector<16x128xf32>
    tpu.vector_store %arg6[%c0_11, %c0_12], %13 {strides = array<i32>} : memref<16x128xf32, #tpu.memory_space<vmem>>, vector<16x128xf32>,
    return
  }
  func.func @transform_0(%arg0: i32) -> (i32, i32) {
    %c0_i32 = arith.constant 0 : i32
    %c0_i32_0 = arith.constant 0 : i32
    return %arg0, %c0_i32 : i32, i32
  }
  func.func @transform_1(%arg0: i32) -> (i32, i32) {
    %c0_i32 = arith.constant 0 : i32
    %c0_i32_0 = arith.constant 0 : i32
    %c0_i32_1 = arith.constant 0 : i32
    return %c0_i32, %c0_i32_0 : i32, i32
  }
  func.func @transform_2(%arg0: i32) -> (i32, i32) {
    %c0_i32 = arith.constant 0 : i32
    %c0_i32_0 = arith.constant 0 : i32
    %c0_i32_1 = arith.constant 0 : i32
    return %c0_i32, %c0_i32_0 : i32, i32
  }
  func.func @transform_3(%arg0: i32) -> (i32, i32) {
    %c0_i32 = arith.constant 0 : i32
    %c0_i32_0 = arith.constant 0 : i32
    %c0_i32_1 = arith.constant 0 : i32
    return %c0_i32, %c0_i32_0 : i32, i32
  }
  func.func @transform_4(%arg0: i32) -> (i32, i32) {
    %c0_i32 = arith.constant 0 : i32
    %c0_i32_0 = arith.constant 0 : i32
    %c0_i32_1 = arith.constant 0 : i32
    return %c0_i32, %c0_i32_0 : i32, i32
  }
  func.func @transform_5(%arg0: i32) -> (i32, i32) {
    %c0_i32 = arith.constant 0 : i32
    %c0_i32_0 = arith.constant 0 : i32
    return %arg0, %c0_i32 : i32, i32
  }
}

</mosaic_0001>

<bundles_post_ra>
// kernel: tpu_custom_call.1
= control target key start
LH: loop header
LB: loop body
LE: loop exit
PB: predicated region body
PF: predicated region fallthrough
CT: control target
= control target key end

     0   :  { %10 = vsyncpa [#allocation3], 0  ;;  %s718_s0 = inlined_call_operand.hbm [shape: bf16[16,128], index: 0, kind: input, shape index: {}]   ;;  %s719_s1 = inlined_call_operand.hbm [shape: bf16[128,128], index: 1, kind: input, shape index: {}]   ;;  %s720_s2 = inlined_call_operand.hbm [shape: f32[1,128], index: 2, kind: input, shape index: {}]   ;;  %s721_s3 = inlined_call_operand.hbm [shape: bf16[128,128], index: 3, kind: input, shape index: {}]   ;;  %s722_s4 = inlined_call_operand.hbm [shape: f32[1,128], index: 4, kind: input, shape index: {}]   ;;  %s723_s5 = inlined_call_operand.hbm [shape: f32[16,128], index: 5, kind: output, shape index: {}]  }
   0x1   :  { %11 = vsyncpa [#allocation6], 0 }
   0x2   :  { %12 = vsyncpa [#allocation9], 0 }
   0x3   :  { %13 = vsyncpa [#allocation4], 0  ;;  %s588_s18 = smov [#allocation5]   ;;  %s589_s20 = smov [#allocation8]  }
   0x4   :  { %s31_s19 = sshll.u32 %s588_s18, 4  ;;  %s53_s21 = sshll.u32 %s589_s20, 4  ;;  %s32_s19 = int_to_ptr.vmem [resolvable:$true] %s31_s19  ;;  %s630_s21 = int_to_ptr.vmem [resolvable:$true] %s53_s21 }
   0x5   :  { %s448_s24 = scalar_lea.hbm %s719_s1, 1024 }
   0x6   :  { %p449_p0 = scmp.ne.s32.totalorder %s719_s1, %s448_s24  ;;  %p452_p1 = scmp.lt.u32.totalorder %s448_s24, %s719_s1 }
   0x8   :  { %p454_p2 = pnand %p452_p1, %p449_p0 }
   0xa   :  { %457 = shalt.err (!%p454_p2)
}
   0xb   :  { %s458_s29 = scalar_lea.vmem %s32_s19, 1024  ;;  %p463_p4 = scmp.lt.s32.totalorder %s32_s19, %s32_s19 }
   0xc   :  { %p459_p3 = scmp.ne.s32.totalorder %s32_s19, %s458_s29  ;;  %p464_p5 = scmp.lt.s32.totalorder %s458_s29, %s458_s29 }
   0xe   :  { %p465_p6 = por %p464_p5, %p463_p4 }
  0x10   :  { %p466_p7 = pnand %p465_p6, %p459_p3 }
  0x12   :  { %469 = shalt.err (!%p466_p7)
}
  0x13   :  { %s590_s30 = smov 64   ;;  %s591_s6 = smov 4  }
  0x14   :  { %37 = dma.hbm_to_vmem [thread:$0]  %s719_s1, 1024, %s32_s19, [#allocation6], %s590_s30, %s590_s30, %s591_s6  }
  0x15   :  { %s470_s11 = scalar_lea.hbm %s721_s3, 1024 }
  0x16   :  { %p471_p8 = scmp.ne.s32.totalorder %s721_s3, %s470_s11  ;;  %p474_p9 = scmp.lt.u32.totalorder %s470_s11, %s721_s3 }
  0x18   :  { %p476_p10 = pnand %p474_p9, %p471_p8 }
  0x1a   :  { %479 = shalt.err (!%p476_p10)
}
  0x1b   :  { %s480_s16 = scalar_lea.vmem %s630_s21, 1024  ;;  %p485_p12 = scmp.lt.s32.totalorder %s630_s21, %s630_s21 }
  0x1c   :  { %p481_p11 = scmp.ne.s32.totalorder %s630_s21, %s480_s16  ;;  %p486_p13 = scmp.lt.s32.totalorder %s480_s16, %s480_s16 }
  0x1e   :  { %p487_p0 = por %p486_p13, %p485_p12 }
  0x20   :  { %p488_p1 = pnand %p487_p0, %p481_p11 }
  0x22   :  { %491 = shalt.err (!%p488_p1)
}
  0x23   :  { %59 = dma.hbm_to_vmem [thread:$0]  %s721_s3, 1024, %s630_s21, [#allocation9], %s590_s30, %s590_s30, %s591_s6  }
  0x24   :  { %s592_s18 = smov [#allocation2]   ;;  %s593_s20 = smov [#allocation7]  }
  0x25   :  { %s19_s19 = sshll.u32 %s592_s18, 4  ;;  %s44_s22 = sshll.u32 %s593_s20, 4  ;;  %s20_s19 = int_to_ptr.vmem [resolvable:$true] %s19_s19  ;;  %s45_s22 = int_to_ptr.vmem [resolvable:$true] %s44_s22 }
  0x26   :  { %s492_s25 = scalar_lea.hbm %s718_s0, 128 }
  0x27   :  { %p493_p2 = scmp.ne.s32.totalorder %s718_s0, %s492_s25  ;;  %p496_p3 = scmp.lt.u32.totalorder %s492_s25, %s718_s0 }
  0x29   :  { %p498_p4 = pnand %p496_p3, %p493_p2 }
  0x2b   :  { %501 = shalt.err (!%p498_p4)
}
  0x2c   :  { %s502_s3 = scalar_lea.vmem %s20_s19, 128  ;;  %p507_p6 = scmp.lt.s32.totalorder %s20_s19, %s20_s19 }
  0x2d   :  { %p503_p5 = scmp.ne.s32.totalorder %s20_s19, %s502_s3  ;;  %p508_p7 = scmp.lt.s32.totalorder %s502_s3, %s502_s3 }
  0x2f   :  { %p509_p8 = por %p508_p7, %p507_p6 }
  0x31   :  { %p510_p9 = pnand %p509_p8, %p503_p5 }
  0x33   :  { %513 = shalt.err (!%p510_p9)
}
  0x34   :  { %25 = dma.hbm_to_vmem [thread:$0]  %s718_s0, 128, %s20_s19, [#allocation3], %s590_s30, %s590_s30, %s591_s6  }
  0x35   :  { %s514_s10 = scalar_lea.hbm %s720_s2, 16 }
  0x36   :  { %p515_p10 = scmp.ne.s32.totalorder %s720_s2, %s514_s10  ;;  %p518_p11 = scmp.lt.u32.totalorder %s514_s10, %s720_s2 }
  0x38   :  { %p520_p12 = pnand %p518_p11, %p515_p10 }
  0x3a   :  { %523 = shalt.err (!%p520_p12)
}
  0x3b   :  { %s524_s15 = scalar_lea.vmem %s45_s22, 16  ;;  %s528_s16 = scalar_lea.vmem %s45_s22, 32 }
  0x3c   :  { %p525_p13 = scmp.ne.s32.totalorder %s45_s22, %s524_s15  ;;  %p529_p0 = scmp.lt.s32.totalorder %s45_s22, %s45_s22 }
  0x3d   :  { %p530_p1 = scmp.lt.s32.totalorder %s528_s16, %s524_s15 }
  0x3f   :  { %p531_p2 = por %p530_p1, %p529_p0 }
  0x41   :  { %p532_p3 = pnand %p531_p2, %p525_p13 }
  0x43   :  { %535 = shalt.err (!%p532_p3)
}
  0x44   :  { %47 = dma.hbm_to_vmem [thread:$0]  %s720_s2, 16, %s45_s22, [#allocation6]  }
  0x45   :  { %s594_s6 = smov [#allocation10]   ;;  %s536_s19 = scalar_lea.hbm %s722_s4, 16 }
  0x46   :  { %s66_s1 = sshll.u32 %s594_s6, 4  ;;  %p537_p4 = scmp.ne.s32.totalorder %s722_s4, %s536_s19  ;;  %s67_s1 = int_to_ptr.vmem [resolvable:$true] %s66_s1 }
  0x47   :  { %p540_p5 = scmp.lt.u32.totalorder %s536_s19, %s722_s4 }
  0x49   :  { %p542_p6 = pnand %p540_p5, %p537_p4 }
  0x4b   :  { %545 = shalt.err (!%p542_p6)
}
  0x4c   :  { %s546_s26 = scalar_lea.vmem %s67_s1, 16  ;;  %s550_s2 = scalar_lea.vmem %s67_s1, 32 }
  0x4d   :  { %p547_p7 = scmp.ne.s32.totalorder %s67_s1, %s546_s26  ;;  %p551_p8 = scmp.lt.s32.totalorder %s67_s1, %s67_s1 }
  0x4e   :  { %p552_p9 = scmp.lt.s32.totalorder %s550_s2, %s546_s26 }
  0x50   :  { %p553_p10 = por %p552_p9, %p551_p8 }
  0x52   :  { %p554_p11 = pnand %p553_p10, %p547_p7 }
  0x54   :  { %557 = shalt.err (!%p554_p11)
}
  0x55   :  { %69 = dma.hbm_to_vmem [thread:$0]  %s722_s4, 16, %s67_s1, [#allocation9]  }
  0x56   :  { %580 = dma.done.wait [#allocation3], 128  }
  0x57   :  { %581 = vsyncadd [#allocation3], 4294967168 }
  0x58   :  { %582 = dma.done.wait [#allocation6], 1040  }
  0x59   :  { %583 = vsyncadd [#allocation6], 4294966256 }
  0x5a   :  { %584 = dma.done.wait [#allocation9], 1040  }
  0x5b   :  { %585 = vsyncadd [#allocation9], 4294966256  ;;  %v595_v0 = vmov 0.0   ;;  %vm596_vm0 = vmmov 0   ;;  %v431_v1 = vld [vmem:[#allocation5] sm:$0xff]   ;;  %v432_v2 = vld [vmem:[#allocation5 + $0x8] sm:$0xff]  }
  0x5c   :  { %379 = vmatprep.subr.bf16.mxu0 %v595_v0  ;;  %395 = vmatprep.mubr.msk.bf16.mxu0 %vm596_vm0, %v595_v0  ;;  %v433_v3 = vld [vmem:[#allocation5 + $0x10] sm:$0xff]   ;;  %v440_v4 = vld [vmem:[#allocation8] sm:$0xff]   ;;  %v434_v5 = vld [vmem:[#allocation5 + $0x18] sm:$0xff]   ;;  %s597_s4 = smov [#allocation11]  }
  0x5d   :  { %399 = vmatprep.subr.bf16.mxu1 %v595_v0  ;;  %415 = vmatprep.mubr.msk.bf16.mxu1 %vm596_vm0, %v595_v0  ;;  %v441_v6 = vld [vmem:[#allocation8 + $0x8] sm:$0xff]   ;;  %v435_v7 = vld [vmem:[#allocation5 + $0x20] sm:$0xff]   ;;  %v442_v8 = vld [vmem:[#allocation8 + $0x10] sm:$0xff]   ;;  %s328_s28 = sshll.u32 %s597_s4, 4  ;;  %s329_s28 = int_to_ptr.vmem [resolvable:$true] %s328_s28 }
  0x5e   :  { %380 = vmatpush3.bf16.msra.mxu0 %v431_v1  ;;  %400 = vmatpush3.bf16.msra.mxu1 %v440_v4  ;;  %v436_v9 = vld [vmem:[#allocation5 + $0x28] sm:$0xff]   ;;  %v443_v10 = vld [vmem:[#allocation8 + $0x18] sm:$0xff]   ;;  %v437_v11 = vld [vmem:[#allocation5 + $0x30] sm:$0xff]   ;;  %s558_s29 = scalar_lea.vmem %s329_s28, 256  ;;  %p563_p13 = scmp.lt.s32.totalorder %s329_s28, %s329_s28 }
  0x5f   :  { %381 = vmatprep.subr.bf16.mxu0 %v595_v0  ;;  %401 = vmatprep.subr.bf16.mxu1 %v595_v0  ;;  %v444_v12 = vld [vmem:[#allocation8 + $0x20] sm:$0xff]   ;;  %v438_v13 = vld [vmem:[#allocation5 + $0x38] sm:$0xff]   ;;  %v445_v14 = vld [vmem:[#allocation8 + $0x28] sm:$0xff]   ;;  %p559_p12 = scmp.ne.s32.totalorder %s329_s28, %s558_s29  ;;  %p564_p0 = scmp.lt.s32.totalorder %s558_s29, %s558_s29 }
  0x60   :  { %v439_v15 = vld [vmem:[#allocation2] sm:$0xff]   ;;  %v342_v18 = vld [vmem:[#allocation7] ss:$0 sm:$0xff]  ;;  %v352_v28 = vld [vmem:[#allocation10] ss:$0 sm:$0xff] }
  0x61   :  { %v446_v16 = vld [vmem:[#allocation8 + $0x30] sm:$0xff]   ;;  %v447_v17 = vld [vmem:[#allocation8 + $0x38] sm:$0xff]   ;;  %p565_p1 = por %p564_p0, %p563_p13 }
  0x62   :  { %382 = vmatpush3.bf16.msra.mxu0 %v432_v2  ;;  %402 = vmatpush3.bf16.msra.mxu1 %v441_v6 }
  0x63   :  { %383 = vmatprep.subr.bf16.mxu0 %v595_v0  ;;  %403 = vmatprep.subr.bf16.mxu1 %v595_v0  ;;  %p566_p2 = pnand %p565_p1, %p559_p12 }
  0x66   :  { %384 = vmatpush3.bf16.msra.mxu0 %v433_v3  ;;  %404 = vmatpush3.bf16.msra.mxu1 %v442_v8 }
  0x67   :  { %385 = vmatprep.subr.bf16.mxu0 %v595_v0  ;;  %405 = vmatprep.subr.bf16.mxu1 %v595_v0 }
  0x6a   :  { %386 = vmatpush3.bf16.msra.mxu0 %v434_v5  ;;  %406 = vmatpush3.bf16.msra.mxu1 %v443_v10 }
  0x6b   :  { %387 = vmatprep.subr.bf16.mxu0 %v595_v0  ;;  %407 = vmatprep.subr.bf16.mxu1 %v595_v0 }
  0x6e   :  { %388 = vmatpush3.bf16.msra.mxu0 %v435_v7  ;;  %408 = vmatpush3.bf16.msra.mxu1 %v444_v12 }
  0x6f   :  { %389 = vmatprep.subr.bf16.mxu0 %v595_v0  ;;  %409 = vmatprep.subr.bf16.mxu1 %v595_v0 }
  0x72   :  { %390 = vmatpush3.bf16.msra.mxu0 %v436_v9  ;;  %410 = vmatpush3.bf16.msra.mxu1 %v445_v14 }
  0x73   :  { %391 = vmatprep.subr.bf16.mxu0 %v595_v0  ;;  %411 = vmatprep.subr.bf16.mxu1 %v595_v0 }
  0x76   :  { %392 = vmatpush3.bf16.msra.mxu0 %v437_v11  ;;  %412 = vmatpush3.bf16.msra.mxu1 %v446_v16 }
  0x77   :  { %393 = vmatprep.subr.bf16.mxu0 %v595_v0  ;;  %413 = vmatprep.subr.bf16.mxu1 %v595_v0 }
  0x7a   :  { %394 = vmatpush3.bf16.msra.mxu0 %v438_v13  ;;  %414 = vmatpush3.bf16.msra.mxu1 %v447_v17 }
  0x7d   :  { %396 = vmatmul.mubr.bf16.vlgmr.msra.gmra.mrb[0].mxu0 %v439_v15 }
 0x150   :  { %v199_v19 = vpop.f32.mrb[0].mxu0 }
 0x151   :  { %v200_v20 = vadd.f32 %v342_v18, %v199_v19  ;;  %v397_v21 = vpop.f32.mrb[1].mxu0 }
 0x152   :  { %v202_v22 = vpop.f32.mrb[2].mxu0 }
 0x153   :  { %v203_v23 = vadd.f32 %v342_v18, %v202_v22  ;;  %v398_v24 = vpop.f32.mrb[3].mxu0  ;;  %v206_v25 = vmax.f32 %v200_v20, 0.0 }
 0x155   :  { %v207_v26 = vmax.f32 %v203_v23, 0.0 }
 0x157   :  { %v208_v27 = vpack.c.bf16 %v207_v26, %v206_v25 }
 0x159   :  { %416 = vmatmul.mubr.bf16.vlgmr.msra.gmra.mrb[0].mxu1 %v208_v27 }
 0x22c   :  { %v314_v29 = vpop.f32.mrb[0].mxu1 }
 0x22d   :  { %v315_v30 = vadd.f32 %v352_v28, %v314_v29  ;;  %v417_v31 = vpop.f32.mrb[1].mxu1 }
 0x22e   :  { %v317_v32 = vpop.f32.mrb[2].mxu1 }
 0x22f   :  { %321 = vst [vmem:[#allocation11] sm:$0xff] %v315_v30  ;;  %v318_v33 = vadd.f32 %v352_v28, %v317_v32  ;;  %v418_v34 = vpop.f32.mrb[3].mxu1 }
 0x231   :  { %322 = vst [vmem:[#allocation11 + $0x8] sm:$0xff] %v318_v33 }
 0x232   :  { %569 = shalt.err (!%p566_p2)
}
 0x233   :  { %s570_s7 = scalar_lea.hbm %s723_s5, 256 }
 0x234   :  { %p571_p3 = scmp.ne.s32.totalorder %s723_s5, %s570_s7  ;;  %p574_p4 = scmp.lt.u32.totalorder %s570_s7, %s723_s5 }
 0x236   :  { %p576_p5 = pnand %p574_p4, %p571_p3 }
 0x238   :  { %579 = shalt.err (!%p576_p5)
}
 0x239   :  { %s598_s12 = smov 128   ;;  %s599_s13 = smov 8  }
 0x23a   :  { %334 = dma.vmem_to_hbm [thread:$0]  %s329_s28, 256, %s723_s5, [#allocation4], %s598_s12, %s598_s12, %s599_s13  }
 0x23b   :  { %586 = dma.done.wait [#allocation4], 256  }
 0x23c   :  { %587 = vsyncadd [#allocation4], 4294967040 }
 0x23d   :  { %338 = vsyncpa [#allocation3], 1 }
 0x23e   :  { %339 = vsyncpa [#allocation6], 1 }
 0x23f   :  { %340 = vsyncpa [#allocation9], 1 }
 0x240   :  { %341 = vsyncpa [#allocation4], 1 }

</bundles_post_ra>
